<compile_context>
chip_gen: v5e
topology: v5e:2x2
jax: 0.10.0
libtpu: 0.0.40
codegen_flags: <defaults>
</compile_context>

<pallas_src>
import functools

import jax
import jax.numpy as jnp
from jax.experimental import pallas as pl
from jax.experimental.pallas import tpu as pltpu


def _round_up(a, b):
    return (a + b - 1) // b * b


def t5_layer_ff_kernel(x_ref, ln_w_ref, wi_ref, wo_ref, o_ref,
                       hnorm_ref, acc_ref, *, eps):
    """One (token tile, d_ff tile) grid step.

    x_ref:   (tm, d_model)      input tokens (constant across the k axis)
    ln_w_ref:(1, d_model)       T5LayerNorm weight
    wi_ref:  (d_model, tff)     wi slice (bf16, pre-transposed)
    wo_ref:  (tff, d_model)     wo slice (bf16, pre-transposed)
    o_ref:   (tm, d_model)      output tile (written at last k step)
    hnorm_ref: (tm, d_model)    bf16 scratch -- normalized activations
    acc_ref: (tm, d_model)      f32 scratch  -- partial wo output accumulator
    """
    k = pl.program_id(1)
    nk = pl.num_programs(1)

    # ---- T5LayerNorm, computed once per token tile (k == 0) ----
    @pl.when(k == 0)
    def _init():
        xf = x_ref[...].astype(jnp.float32)
        variance = jnp.mean(xf * xf, axis=-1, keepdims=True)
        h = xf * jax.lax.rsqrt(variance + eps)
        h = ln_w_ref[...].astype(jnp.float32) * h           # (1, d_model) bcast
        hnorm_ref[...] = h.astype(hnorm_ref.dtype)          # bf16 for the MXU
        acc_ref[...] = jnp.zeros_like(acc_ref)

    # ---- partial T5DenseActDense over this d_ff chunk ----
    # relu is elementwise over d_ff, so the d_ff reduction splits exactly:
    #   sum_k relu(h @ wi[:, k]) @ wo[k, :]
    p = jnp.dot(hnorm_ref[...], wi_ref[...],
                preferred_element_type=jnp.float32)          # (tm, tff) f32
    p = jnp.maximum(p, 0.0)                                  # ReLU
    acc_ref[...] += jnp.dot(p.astype(wo_ref.dtype), wo_ref[...],
                            preferred_element_type=jnp.float32)

    # ---- residual add + writeback on the last d_ff step ----
    @pl.when(k == nk - 1)
    def _finalize():
        o_ref[...] = (x_ref[...].astype(jnp.float32)
                      + acc_ref[...]).astype(o_ref.dtype)


def t5_layer_ff(x, ln_weight, wi_t, wo_t, *, eps=1e-6,
                tm=256, tff=512, compute_dtype=jnp.bfloat16):
    """T5LayerFF forward.

    x:         (B, S, d_model) float32
    ln_weight: (d_model,)
    wi_t:      (d_model, d_ff)   == nn.Linear(d_model, d_ff).weight.T
    wo_t:      (d_ff, d_model)   == nn.Linear(d_ff, d_model).weight.T
    """
    B, S, d_model = x.shape
    d_ff = wi_t.shape[1]
    T = B * S

    x2 = x.reshape(T, d_model)
    ln_w2 = ln_weight.reshape(1, d_model).astype(jnp.float32)

    # bf16 weights: halves weight DMA bytes and uses the MXU's bf16 path
    # while both dots still accumulate in f32.
    wi_c = wi_t.astype(compute_dtype)
    wo_c = wo_t.astype(compute_dtype)

    # --- token tile: multiple of 8 sublanes; pad T so tm divides it ---
    tm = max(8, min(_round_up(tm, 8), _round_up(T, 8)))
    Tp = _round_up(T, tm)
    if Tp != T:
        # zero rows are harmless: rsqrt(eps)*0 = 0 -> FF(0) = 0 -> residual 0
        x2 = jnp.pad(x2, ((0, Tp - T), (0, 0)))

    # --- d_ff tile: must divide d_ff and be a multiple of 128 lanes,
    #     otherwise fall back to a single full-d_ff block ---
    if not (d_ff % tff == 0 and tff % 128 == 0):
        tff = d_ff
    nk = d_ff // tff

    grid = (Tp // tm, nk)

    itemsize = lambda a: a.dtype.itemsize
    cost = pl.CostEstimate(
        flops=4 * Tp * d_model * d_ff,              # two matmuls, 2 flops/MAC
        transcendentals=Tp,                         # one rsqrt per token
        bytes_accessed=(x2.size * itemsize(x2) * 2  # read x + write out
                        + wi_c.size * itemsize(wi_c)
                        + wo_c.size * itemsize(wo_c)
                        + ln_w2.size * itemsize(ln_w2)),
    )

    out2 = pl.pallas_call(
        functools.partial(t5_layer_ff_kernel, eps=eps),
        out_shape=jax.ShapeDtypeStruct((Tp, d_model), x.dtype),
        grid_spec=pltpu.PrefetchScalarGridSpec(
            num_scalar_prefetch=0,
            grid=grid,
            in_specs=[
                pl.BlockSpec((tm, d_model), lambda i, k: (i, 0)),    # x tile
                pl.BlockSpec((1, d_model), lambda i, k: (0, 0)),     # ln weight
                pl.BlockSpec((d_model, tff), lambda i, k: (0, k)),   # wi slice
                pl.BlockSpec((tff, d_model), lambda i, k: (k, 0)),   # wo slice
            ],
            out_specs=pl.BlockSpec((tm, d_model), lambda i, k: (i, 0)),
            scratch_shapes=[
                pltpu.VMEM((tm, d_model), compute_dtype),   # normalized acts
                pltpu.VMEM((tm, d_model), jnp.float32),     # f32 accumulator
            ],
        ),
        compiler_params=pltpu.CompilerParams(
            dimension_semantics=("parallel", "arbitrary"),
            vmem_limit_bytes=48 * 1024 * 1024,   # fits v7x's 64 MiB with headroom
        ),
        cost_estimate=cost,
    )(x2, ln_w2, wi_c, wo_c)

    return out2[:T].reshape(B, S, d_model)


def t5_layer_ff_reference(x, ln_weight, wi_t, wo_t, *, eps=1e-6,
                          compute_dtype=jnp.bfloat16):
    """Pure-JAX reference matching the kernel's numerics (bf16 matmul operands,
    f32 accumulation)."""
    xf = x.astype(jnp.float32)
    variance = jnp.mean(xf * xf, axis=-1, keepdims=True)
    h = xf * jax.lax.rsqrt(variance + eps)
    h = (ln_weight * h).astype(compute_dtype)
    p = jnp.dot(h, wi_t.astype(compute_dtype),
                preferred_element_type=jnp.float32)
    p = jnp.maximum(p, 0.0)
    y = jnp.dot(p.astype(compute_dtype), wo_t.astype(compute_dtype),
                preferred_element_type=jnp.float32)
    return x + y


if __name__ == "__main__":
    # Small but lane-friendly T5-like config (correctness smoke test).
    # Real T5 tuning should use d_model >= 512, d_ff >= 2048 with the default
    # tm=256 / tff=512 tiles.
    B, S, d_model, d_ff = 2, 64, 128, 256
    eps = 1e-6

    key = jax.random.PRNGKey(0)
    kx, kwi, kwo = jax.random.split(key, 3)

    x = jax.random.normal(kx, (B, S, d_model), dtype=jnp.float32)
    # nn.Linear(d_model, d_ff, bias=False).weight has shape (d_ff, d_model);
    # pass the transpose so the kernel computes h @ wi_t directly.
    wi_weight = jax.random.normal(kwi, (d_ff, d_model), dtype=jnp.float32) * 0.05
    wo_weight = jax.random.normal(kwo, (d_model, d_ff), dtype=jnp.float32) * 0.05
    ln_weight = jnp.ones((d_model,), dtype=jnp.float32)  # T5LayerNorm init = ones

    wi_t = wi_weight.T  # (d_model, d_ff)
    wo_t = wo_weight.T  # (d_ff, d_model)

    # tm=64 -> 2 token tiles; tff=128 -> 2 d_ff reduction steps: exercises both
    # grid axes even at this small shape.
    out = t5_layer_ff(x, ln_weight, wi_t, wo_t, eps=eps, tm=64, tff=128)
    out = jax.block_until_ready(out)

    ref = t5_layer_ff_reference(x, ln_weight, wi_t, wo_t, eps=eps)
    assert out.shape == (B, S, d_model)
    assert jnp.allclose(out, ref, atol=5e-3, rtol=5e-3), (
        float(jnp.max(jnp.abs(out - ref))))

    print("KERNEL_OK")
</pallas_src>

<mosaic_0001>
module attributes {stable_mosaic.version = 11 : i64} {
  func.func @t5_layer_ff_kernel(%arg0: i32, %arg1: i32, %arg2: memref<64x128xf32, #tpu.memory_space<vmem>>, %arg3: memref<1x128xf32, #tpu.memory_space<vmem>>, %arg4: memref<128x128xbf16, #tpu.memory_space<vmem>>, %arg5: memref<128x128xbf16, #tpu.memory_space<vmem>>, %arg6: memref<64x128xf32, #tpu.memory_space<vmem>>, %arg7: memref<64x128xbf16, #tpu.memory_space<vmem>>, %arg8: memref<64x128xf32, #tpu.memory_space<vmem>>) attributes {dimension_semantics = [#tpu.dimension_semantics<parallel>, #tpu.dimension_semantics<arbitrary>], iteration_bounds = array<i64: 2, 2>, scalar_prefetch = 0 : i64, scratch_operands = 2 : i64, tpu.core_type = #tpu.core_type<tc>, window_params = [{transform_indices = @transform_0, window_bounds = array<i64: 64, 128>}, {pipeline_mode = #tpu.pipeline_mode<synchronous>, transform_indices = @transform_1, window_bounds = array<i64: 1, 128>}, {transform_indices = @transform_2, window_bounds = array<i64: 128, 128>}, {transform_indices = @transform_3, window_bounds = array<i64: 128, 128>}, {transform_indices = @transform_4, window_bounds = array<i64: 64, 128>}]} {
    %c0_i32 = arith.constant 0 : i32
    %0 = arith.cmpi eq, %arg1, %c0_i32 : i32
    %1 = arith.extui %0 : i1 to i32
    %c0_i32_0 = arith.constant 0 : i32
    %2 = arith.cmpi ne, %1, %c0_i32_0 : i32
    scf.if %2 {
      %c0_13 = arith.constant 0 : index
      %c0_14 = arith.constant 0 : index
      %17 = vector.load %arg2[%c0_13, %c0_14] : memref<64x128xf32, #tpu.memory_space<vmem>>, vector<64x128xf32>
      %18 = arith.mulf %17, %17 : vector<64x128xf32>
      %cst_15 = arith.constant dense<0.000000e+00> : vector<64xf32>
      %19 = vector.multi_reduction <add>, %18, %cst_15 [1] : vector<64x128xf32> to vector<64xf32>
      %20 = vector.shape_cast %19 : vector<64xf32> to vector<64x1xf32>
      %cst_16 = arith.constant 1.280000e+02 : f32
      %21 = vector.broadcast %cst_16 : f32 to vector<64x1xf32>
      %22 = arith.divf %20, %21 : vector<64x1xf32>
      %cst_17 = arith.constant 9.99999997E-7 : f32
      %23 = vector.broadcast %cst_17 : f32 to vector<64x1xf32>
      %24 = arith.addf %22, %23 : vector<64x1xf32>
      %25 = math.rsqrt %24 : vector<64x1xf32>
      %26 = vector.broadcast %25 : vector<64x1xf32> to vector<64x128xf32>
      %27 = arith.mulf %17, %26 : vector<64x128xf32>
      %c0_18 = arith.constant 0 : index
      %c0_19 = arith.constant 0 : index
      %28 = vector.load %arg3[%c0_18, %c0_19] : memref<1x128xf32, #tpu.memory_space<vmem>>, vector<1x128xf32>
      %29 = vector.broadcast %28 : vector<1x128xf32> to vector<64x128xf32>
      %30 = arith.mulf %29, %27 : vector<64x128xf32>
      %31 = arith.truncf %30 : vector<64x128xf32> to vector<64x128xbf16>
      %c0_20 = arith.constant 0 : index
      %c0_21 = arith.constant 0 : index
      %32 = vector.load %arg7[%c0_20, %c0_21] : memref<64x128xbf16, #tpu.memory_space<vmem>>, vector<64x128xbf16>
      tpu.vector_store %arg7[%c0_20, %c0_21], %31 {strides = array<i32>} : memref<64x128xbf16, #tpu.memory_space<vmem>>, vector<64x128xbf16>,
      %cst_22 = arith.constant 0.000000e+00 : f32
      %33 = vector.broadcast %cst_22 : f32 to vector<64x128xf32>
      %c0_23 = arith.constant 0 : index
      %c0_24 = arith.constant 0 : index
      %34 = vector.load %arg8[%c0_23, %c0_24] : memref<64x128xf32, #tpu.memory_space<vmem>>, vector<64x128xf32>
      tpu.vector_store %arg8[%c0_23, %c0_24], %33 {strides = array<i32>} : memref<64x128xf32, #tpu.memory_space<vmem>>, vector<64x128xf32>,
    } else {
    }
    %c0 = arith.constant 0 : index
    %c0_1 = arith.constant 0 : index
    %3 = vector.load %arg7[%c0, %c0_1] : memref<64x128xbf16, #tpu.memory_space<vmem>>, vector<64x128xbf16>
    %c0_2 = arith.constant 0 : index
    %c0_3 = arith.constant 0 : index
    %4 = vector.load %arg4[%c0_2, %c0_3] : memref<128x128xbf16, #tpu.memory_space<vmem>>, vector<128x128xbf16>
    %cst = arith.constant dense<0.000000e+00> : vector<64x128xf32>
    %5 = tpu.matmul %3, %4, %cst {dimension_numbers = #tpu.dot_dimension_numbers<[1], [0], [0], [1], [0, 0, 1, 1], [], []>} : vector<64x128xbf16>, vector<128x128xbf16>, vector<64x128xf32> -> vector<64x128xf32>
    %cst_4 = arith.constant 0.000000e+00 : f32
    %6 = vector.broadcast %cst_4 : f32 to vector<64x128xf32>
    %7 = arith.maximumf %5, %6 : vector<64x128xf32>
    %c0_5 = arith.constant 0 : index
    %c0_6 = arith.constant 0 : index
    %8 = vector.load %arg8[%c0_5, %c0_6] : memref<64x128xf32, #tpu.memory_space<vmem>>, vector<64x128xf32>
    %9 = arith.truncf %7 : vector<64x128xf32> to vector<64x128xbf16>
    %c0_7 = arith.constant 0 : index
    %c0_8 = arith.constant 0 : index
    %10 = vector.load %arg5[%c0_7, %c0_8] : memref<128x128xbf16, #tpu.memory_space<vmem>>, vector<128x128xbf16>
    %cst_9 = arith.constant dense<0.000000e+00> : vector<64x128xf32>
    %11 = tpu.matmul %9, %10, %cst_9 {dimension_numbers = #tpu.dot_dimension_numbers<[1], [0], [0], [1], [0, 0, 1, 1], [], []>} : vector<64x128xbf16>, vector<128x128xbf16>, vector<64x128xf32> -> vector<64x128xf32>
    %12 = arith.addf %8, %11 : vector<64x128xf32>
    %c0_10 = arith.constant 0 : index
    %c0_11 = arith.constant 0 : index
    %13 = vector.load %arg8[%c0_10, %c0_11] : memref<64x128xf32, #tpu.memory_space<vmem>>, vector<64x128xf32>
    tpu.vector_store %arg8[%c0_10, %c0_11], %12 {strides = array<i32>} : memref<64x128xf32, #tpu.memory_space<vmem>>, vector<64x128xf32>,
    %c1_i32 = arith.constant 1 : i32
    %14 = arith.cmpi eq, %arg1, %c1_i32 : i32
    %15 = arith.extui %14 : i1 to i32
    %c0_i32_12 = arith.constant 0 : i32
    %16 = arith.cmpi ne, %15, %c0_i32_12 : i32
    scf.if %16 {
      %c0_13 = arith.constant 0 : index
      %c0_14 = arith.constant 0 : index
      %17 = vector.load %arg2[%c0_13, %c0_14] : memref<64x128xf32, #tpu.memory_space<vmem>>, vector<64x128xf32>
      %c0_15 = arith.constant 0 : index
      %c0_16 = arith.constant 0 : index
      %18 = vector.load %arg8[%c0_15, %c0_16] : memref<64x128xf32, #tpu.memory_space<vmem>>, vector<64x128xf32>
      %19 = arith.addf %17, %18 : vector<64x128xf32>
      %c0_17 = arith.constant 0 : index
      %c0_18 = arith.constant 0 : index
      %20 = vector.load %arg6[%c0_17, %c0_18] : memref<64x128xf32, #tpu.memory_space<vmem>>, vector<64x128xf32>
      tpu.vector_store %arg6[%c0_17, %c0_18], %19 {strides = array<i32>} : memref<64x128xf32, #tpu.memory_space<vmem>>, vector<64x128xf32>,
    } else {
    }
    return
  }
  func.func @transform_0(%arg0: i32, %arg1: i32) -> (i32, i32) {
    %c0_i32 = arith.constant 0 : i32
    %c0_i32_0 = arith.constant 0 : i32
    return %arg0, %c0_i32 : i32, i32
  }
  func.func @transform_1(%arg0: i32, %arg1: i32) -> (i32, i32) {
    %c0_i32 = arith.constant 0 : i32
    %c0_i32_0 = arith.constant 0 : i32
    %c0_i32_1 = arith.constant 0 : i32
    return %c0_i32, %c0_i32_0 : i32, i32
  }
  func.func @transform_2(%arg0: i32, %arg1: i32) -> (i32, i32) {
    %c0_i32 = arith.constant 0 : i32
    %c0_i32_0 = arith.constant 0 : i32
    return %c0_i32, %arg1 : i32, i32
  }
  func.func @transform_3(%arg0: i32, %arg1: i32) -> (i32, i32) {
    %c0_i32 = arith.constant 0 : i32
    %c0_i32_0 = arith.constant 0 : i32
    return %arg1, %c0_i32 : i32, i32
  }
  func.func @transform_4(%arg0: i32, %arg1: i32) -> (i32, i32) {
    %c0_i32 = arith.constant 0 : i32
    %c0_i32_0 = arith.constant 0 : i32
    return %arg0, %c0_i32 : i32, i32
  }
}

</mosaic_0001>

<bundles_post_ra>
// kernel: tpu_custom_call.1
= control target key start
LH: loop header
LB: loop body
LE: loop exit
PB: predicated region body
PF: predicated region fallthrough
CT: control target
= control target key end

     0   :  { %s1999_s0 = inlined_call_operand.hbm [shape: f32[128,128], index: 0, kind: input, shape index: {}]   ;;  %s2000_s1 = inlined_call_operand.hbm [shape: f32[1,128], index: 1, kind: input, shape index: {}]   ;;  %s2001_s2 = inlined_call_operand.hbm [shape: bf16[128,256], index: 2, kind: input, shape index: {}]   ;;  %s2002_s3 = inlined_call_operand.hbm [shape: bf16[256,128], index: 3, kind: input, shape index: {}]   ;;  %s2003_s4 = inlined_call_operand.hbm [shape: f32[128,128], index: 4, kind: output, shape index: {}]  }
   0x1   :  { %2010 = sst [smem:[#allocation22_spill]] %s1999_s0 }
   0x2   :  { %2011 = sst [smem:[#allocation23_spill]] %s2000_s1 }
   0x3   :  { %2012 = sst [smem:[#allocation24_spill]] %s2001_s2 }
   0x4   :  { %9 = vsyncpa [#allocation5], 0 }
   0x5   :  { %11 = vsyncpa [#allocation5 + $0x1], 0 }
   0x6   :  { %12 = vsyncpa [#allocation8], 0 }
   0x7   :  { %13 = vsyncpa [#allocation6], 0 }
   0x8   :  { %15 = vsyncpa [#allocation6 + $0x1], 0  ;;  %s1552_s15 = smov 0   ;;  %s1554_s16 = smov 0  }
   0x9   :  { %s1556_s17 = smov 0   ;;  %s1558_s18 = smov 0  }
   0xa   :  { %s1560_s19 = smov 0   ;;  %s1562_s20 = smov 0  }
   0xb   :  { %s1564_s21 = smov 0   ;;  %s1566_s22 = smov 0  }
   0xc   :  { %s1568_s23 = smov 0   ;;  %s1570_s24 = smov 0  }
   0xd   :  { %s1572_s25 = smov 0  }
   0xe LB: > { %2013 = sst [smem:[#allocation16_spill]] %s1496_s20  ;;  %s30_s26 = sadd.s32 1, %s1508_s23  ;;  %s1516_s25 = sphi %s1572_s25, %s21_s25   ;;  %s1512_s24 = sphi %s1570_s24, %s2043_s24   ;;  %s1508_s23 = sphi %s1568_s23, %s2050_s23   ;;  %s1504_s22 = sphi %s1566_s22, %s2041_s22   ;;  %s1500_s21 = sphi %s1564_s21, %s2049_s21   ;;  %s1496_s20 = sphi %s1562_s20, %s2040_s20   ;;  %s1492_s19 = sphi %s1560_s19, %s2048_s19   ;;  %s1488_s18 = sphi %s1558_s18, %s2047_s18   ;;  %s1484_s17 = sphi %s1556_s17, %s2046_s17   ;;  %s1480_s16 = sphi %s1554_s16, %s2045_s16   ;;  %s1476_s15 = sphi %s1552_s15, %s2044_s15  }
   0xf   : > { %2014 = sst [smem:[#allocation17_spill]] %s1512_s24  ;;  %s33_s27 = sadd.s32 1, %s1512_s24 }
  0x10   : > { %p31_p0 = scmp.ge.s32.totalorder %s30_s26, 2  ;;  %s40_s28 = sadd.s32 1, %s1496_s20 }
  0x11   : > { %p47_p1 = scmp.ne.s32.totalorder %s1496_s20, %s1492_s19  ;;  %p48_p2 = scmp.eq.s32.totalorder %s1516_s25, 0 }
  0x12   : > { %s2052_s26 = smov (%p31_p0, %s30_s26), 0  ;;  %s2054_s27 = smov (!%p31_p0, %s33_s27), %s1512_s24 }
  0x13   : > { %2015 = sst [smem:[#allocation18_spill]] %s2052_s26  ;;  %p1621_p3 = por %p48_p2, %p47_p1 }
  0x14   : > { %s84_s30 = ssub.s32 %s1508_s23, %s2052_s26  ;;  %p35_p4 = scmp.ge.s32.totalorder %s2054_s27, 2 }
  0x15   : > { %p1627_p5 = scmp.eq.s32.totalorder %s84_s30, 0  ;;  %p1147_p6 = scmp.lt.s32.totalorder %s1516_s25, 4 }
  0x16   : > { %s2056_s27 = smov (%p35_p4, %s2054_s27), 0  ;;  %s188_s6 = sand.u32 1, %s1516_s25  }
  0x17   : > { %2018 = sst [smem:[#allocation19_spill]] %s2056_s27  ;;  %s190_s7 = sand.u32 1, %s1496_s20  }
  0x18   : > { %s37_s8 = ssub.s32 %s1512_s24, %s2056_s27  ;;  %s953_s9 = sshll.u32 %s190_s7, 6 }
  0x19   : > { %p38_p7 = scmp.eq.s32.totalorder %s37_s8, 0  ;;  %s1054_s10 = sshll.u32 %s1512_s24, 6 }
  0x1a   : > { %s2020_s0 = sld [smem:[#allocation22_spill]]  ;;  %s192_s30 = scalar_lea.vmem [#allocation4], %s953_s9 }
  0x1b   : > { %s1640_s11 = scalar_select %p38_p7, %s1496_s20, %s40_s28  }
  0x1c   : > { %s200_s26 = sshll.u32 %s192_s30, 4  ;;  %p1133_p8 = pnand %p1147_p6, %p1621_p3  ;;  %s201_s26 = int_to_ptr.vmem [resolvable:$true] %s200_s26 }
  0x1d   : > { %2019 = sst [smem:[#allocation20_spill]] %s1640_s11  ;;  %s1649_s7 = scalar_lea.sflag [#allocation5], %s188_s6 }
  0x1e   : > { %s1518_s8 = smov 128   ;;  %s1519_s28 = smov 8  }
  0x1f   : > { %s957_s24 = sshll.u32 %s1508_s23, 2  ;;  %s87_s12 = sadd.s32 1, %s1484_s17 }
  0x20   : > { %s197_s14 = scalar_lea.hbm %s2020_s0, %s1054_s10  ;;  %p94_p9 = scmp.ne.s32.totalorder %s1484_s17, %s1480_s16 }
  0x21   : > { %s198_s27 = sshll.u32 %s197_s14, 4  ;;  %s212_s29 = sand.u32 1, %s1484_s17   ;;  %s199_s27 = int_to_ptr.hbm [resolvable:$true] %s198_s27 }
  0x22   : > { %1135 = dma.hbm_to_vmem [thread:$0]  (!%p1133_p8), %s199_s27, 1024, %s201_s26, %s1649_s7, %s1518_s8, %s1518_s8, %s1519_s28  }
  0x23   : > { %s1659_s9 = scalar_select %p1627_p5, %s1484_s17, %s87_s12  }
  0x24   : > { %p96_p10 = por %p94_p9, %p48_p2  ;;  %s1664_s6 = sshll.u32 %s212_s29, 6 }
  0x25   : > { %2021 = sst [smem:[#allocation21_spill]] %s1659_s9  ;;  %s214_s5 = scalar_lea.vmem [#allocation9], %s1664_s6 }
  0x26   : > { %s2022_s2 = sld [smem:[#allocation24_spill]]  ;;  %s221_s14 = sshll.u32 %s214_s5, 4  ;;  %s222_s14 = int_to_ptr.vmem [resolvable:$true] %s221_s14 }
  0x27   : > { %p1672_p11 = pnand %p1147_p6, %p96_p10  ;;  %s2007_s28 = smov 64  }
  0x28   : > { %s2008_s12 = smov 4   ;;  %s949_s29 = sadd.s32 4294967294, %s1516_s25  }
  0x29   : > { %p53_p12 = scmp.ne.s32.totalorder %s1492_s19, %s1488_s18  ;;  %p100_p0 = scmp.ne.s32.totalorder %s1480_s16, %s1476_s15 }
  0x2a   : > { %p156_p3 = scmp.eq.s32.totalorder %s949_s29, 3  ;;  %p950_p8 = scmp.ge.s32.totalorder %s1516_s25, 1 }
  0x2b   : > { %p163_p9 = scmp.lt.s32.totalorder %s1516_s25, 5  ;;  %s2028_s1 = sld [smem:[#allocation23_spill]] }
  0x2c   : > { %s218_s27 = scalar_lea.hbm %s2022_s2, %s957_s24  ;;  %s1682_s24 = sadd.s32 4294967295, %s1516_s25  }
  0x2d   : > { %s219_s13 = sshll.u32 %s218_s27, 4  ;;  %p54_p13 = scmp.eq.s32.totalorder %s1682_s24, 0  ;;  %s220_s13 = int_to_ptr.hbm [resolvable:$true] %s219_s13 }
  0x2e   : > { %1138 = dma.hbm_to_vmem [thread:$0]  (!%p1672_p11), %s220_s13, 1024, %s222_s14, %s1649_s7, %s1518_s8, %s2007_s28, %s2008_s12  }
  0x2f   : > { %p150_p2 = scmp.eq.s32.totalorder %s1682_s24, 3  ;;  %p1693_p4 = por %p54_p13, %p53_p12 }
  0x30   : > { %p1699_p5 = por %p100_p0, %p54_p13  ;;  %p1710_p7 = por %p156_p3, %p53_p12 }
  0x31   : > { %p1706_p6 = por %p150_p2, %p47_p1  ;;  %s175_s5 = sshll.u32 %s2028_s1, 4  ;;  %s176_s5 = int_to_ptr.hbm [resolvable:$true] %s175_s5 }
  0x32   : > { %p1719_p10 = pnand %p950_p8, %p163_p9  ;;  %s1522_s29 = smov [#allocation7]  }
  0x33   : > { %s177_s28 = sshll.u32 %s1522_s29, 4  ;;  %s1055_s12 = sshll.u32 %s1508_s23, 6  ;;  %s178_s28 = int_to_ptr.vmem [resolvable:$true] %s177_s28 }
  0x34   : > { %p1128_p1 = pneg %p1719_p10  ;;  %s240_s27 = scalar_lea.hbm %s2002_s3, %s1055_s12 }
  0x35   : > { %s241_s13 = sshll.u32 %s240_s27, 4  ;;  %s235_s1 = scalar_lea.vmem [#allocation10], %s1664_s6  ;;  %s242_s13 = int_to_ptr.hbm [resolvable:$true] %s241_s13 }
  0x36   : > { %p1129_p12 = pnand %p1128_p1, %p54_p13  ;;  %s243_s11 = sshll.u32 %s235_s1, 4  ;;  %s244_s11 = int_to_ptr.vmem [resolvable:$true] %s243_s11 }
  0x37   : > { %s2030_s20 = smov 4   ;;  %s2031_s9 = smov 64  }
  0x38   : > { %1131 = dma.hbm_to_vmem [thread:$0]  (!%p1129_p12), %s176_s5, 16, %s178_s28, [#allocation8]  }
  0x39   : > { %1141 = dma.hbm_to_vmem [thread:$0]  (!%p1672_p11), %s242_s13, 1024, %s244_s11, %s1649_s7, %s2031_s9, %s2031_s9, %s2030_s20  }
  0x3a   : > { %255 = sbr.rel (%p1719_p10) target bundleno = 608 (0x260), region = 36  ;;  %s257_s0 = sand.u32 (!%p1719_p10), 1, %s1682_s24  }
  0x3b   : > { %s259_s2 = sand.u32 (!%p1719_p10), 1, %s1492_s19   ;;  %s258_s1 = scalar_lea.sflag (!%p1719_p10), [#allocation5], %s257_s0 }
  0x3c   : > { %s962_s6 = sshll.u32 (!%p1719_p10), %s259_s2, 6 }
  0x3d   : > { %s1744_s12 = scalar_lea.vmem (!%p1719_p10), [#allocation4], %s962_s6 }
  0x3f   : > { %1459 = dma.done.wait (%p1693_p4), %s258_s1, 1024  }
  0x40   : > { %1461 = vsyncadd (%p1693_p4), %s258_s1, 4294966272 }
  0x41   : > { %1463 = dma.done.wait (%p54_p13), [#allocation8], 16  }
  0x42   : > { %1465 = vsyncadd (%p54_p13), [#allocation8], 4294967280  ;;  %s274_s20 = sand.u32 1, %s1480_s16  }
  0x43   : > { %s964_s11 = sshll.u32 %s274_s20, 6 }
  0x44   : > { %s1755_s7 = scalar_lea.vmem [#allocation9], %s964_s11 }
  0x45   : > { %1467 = dma.done.wait (%p1699_p5), %s258_s1, 2048  }
  0x46   : > { %1469 = vsyncadd (%p1699_p5), %s258_s1, 4294965248  ;;  %s1761_s9 = scalar_lea.vmem [#allocation10], %s964_s11  ;;  %s1763_s30 = scalar_lea.vmem [#allocation11], %s962_s6 }
  0x47   : > { %p967_p11 = scmp.ne.s32.totalorder %s1500_s21, 0 }
  0x49   : > { %328 = sbr.rel (%p967_p11) target bundleno = 246 (0xf6), region = 56 }
  0x4e   : > { %v1767_v0 = vld [vmem:[%s1744_s12 + $0x20] sm:$0xff]  ;;  %v1770_v1 = vld [vmem:[%s1744_s12 + $0x10] sm:$0xff]  ;;  %v1782_v6 = vld [vmem:[%s1744_s12 + $0x28] sm:$0xff]  ;;  %v1523_v16 = vmov 128.0  }
  0x4f   : > { %v1773_v2 = vld [vmem:[%s1744_s12] sm:$0xff]  ;;  %v341_v3 = vmul.f32 %v1767_v0, %v1767_v0  ;;  %v339_v4 = vmul.f32 %v1770_v1, %v1770_v1  ;;  %v1785_v7 = vld [vmem:[%s1744_s12 + $0x18] sm:$0xff]  ;;  %v1788_v8 = vld [vmem:[%s1744_s12 + $0x8] sm:$0xff]  ;;  %v342_v9 = vmul.f32 %v1782_v6, %v1782_v6  ;;  %1248 = vrcp.f32 %v1523_v16 }
  0x50   : > { %v337_v5 = vmul.f32 %v1773_v2, %v1773_v2  ;;  %v340_v10 = vmul.f32 %v1785_v7, %v1785_v7  ;;  %v338_v11 = vmul.f32 %v1788_v8, %v1788_v8  ;;  %v1797_v12 = vld [vmem:[%s1744_s12 + $0x38] sm:$0xff]  ;;  %v1800_v13 = vld [vmem:[%s1744_s12 + $0x30] sm:$0xff] }
  0x51   : > { %353 = vadd.xlane.f32.xlu2 %v341_v3  ;;  %349 = vadd.xlane.f32.xlu1 %v339_v4  ;;  %v344_v14 = vmul.f32 %v1797_v12, %v1797_v12  ;;  %v343_v15 = vmul.f32 %v1800_v13, %v1800_v13 }
  0x52   : > { %345 = vadd.xlane.f32.xlu0 %v337_v5 }
  0x55   : > { %v1249_v17 = vpop.eup %1248 }
  0x56   : > { %v362_v18 = vmul.f32 128.0, %v1249_v17  ;;  %vm366_vm0 = vweird.f32 %v1249_v17 }
  0x58   : > { %v363_v19 = vsub.f32 1.0, %v362_v18 }
  0x59   : > { %355 = vadd.xlane.f32.xlu2 %v342_v9  ;;  %351 = vadd.xlane.f32.xlu1 %v340_v10 }
  0x5a   : > { %347 = vadd.xlane.f32.xlu0 %v338_v11  ;;  %v364_v20 = vmul.f32 %v1249_v17, %v363_v19 }
  0x5c   : > { %v365_v21 = vadd.f32 %v1249_v17, %v364_v20 }
  0x5e   : > { %v367_v22 = vsel %vm366_vm0, %v1249_v17, %v365_v21 }
  0x61   : > { %359 = vadd.xlane.f32.xlu1 %v344_v14 }
  0x62   : > { %357 = vadd.xlane.f32.xlu0 %v343_v15 }
  0xc4   : > { %v354_v23 = vpop.xlane.xlu2 %353  ;;  %v350_v24 = vpop.xlane.xlu1 %349 }
  0xc5   : > { %v372_v25 = vmul.f32 %v367_v22, %v354_v23  ;;  %v370_v26 = vmul.f32 %v367_v22, %v350_v24  ;;  %v346_v27 = vpop.xlane.xlu0 %345 }
  0xc6   : > { %v368_v28 = vmul.f32 %v367_v22, %v346_v27 }
  0xc7   : > { %v380_v29 = vadd.f32 1e-06, %v372_v25  ;;  %v1806_v30 = vadd.f32 1e-06, %v370_v26 }
  0xc8   : > { %v1808_v31 = vadd.f32 1e-06, %v368_v28 }
  0xc9   : > { %1250 = vrsqrt.f32 %v380_v29  ;;  %vm430_vm1 = vweird.f32 %v380_v29  ;;  %vm410_vm2 = vweird.f32 %v1806_v30 }
  0xca   : > { %1252 = vrsqrt.f32 %v1806_v30  ;;  %vm390_vm4 = vweird.f32 %v1808_v31 }
  0xcb   : > { %1254 = vrsqrt.f32 %v1808_v31 }
  0xcc   : > { %v356_v32 = vpop.xlane.xlu2 %355  ;;  %v352_v33 = vpop.xlane.xlu1 %351 }
  0xcd   : > { %v373_v34 = vmul.f32 %v367_v22, %v356_v32  ;;  %v371_v35 = vmul.f32 %v367_v22, %v352_v33  ;;  %v348_v36 = vpop.xlane.xlu0 %347 }
  0xce   : > { %v369_v37 = vmul.f32 %v367_v22, %v348_v36 }
  0xcf   : > { %v1812_v38 = vpop.eup %1250  ;;  %v1814_v39 = vadd.f32 1e-06, %v373_v34  ;;  %v1816_v40 = vadd.f32 1e-06, %v371_v35  ;;  %v1524_v34 = vmov 0.0  }
  0xd0   : > { %v1818_v41 = vpop.eup %1252  ;;  %v425_v42 = vmul.f32 %v1812_v38, %v380_v29  ;;  %v1821_v43 = vadd.f32 1e-06, %v369_v37  ;;  %vm431_vm3 = vweird.f32 %v1812_v38  ;;  %500 = vst [vmem:[#allocation3] sm:$0xff] %v1524_v34  ;;  %v1247_v35 = vld [vmem:[#allocation7] ss:$0 sm:$0xff] }
  0xd1   : > { %v1823_v44 = vpop.eup %1254  ;;  %v405_v45 = vmul.f32 %v1818_v41, %v1806_v30  ;;  %1256 = vrsqrt.f32 %v1814_v39  ;;  %vm411_vm5 = vweird.f32 %v1818_v41  ;;  %vm440_vm6 = vweird.f32 %v1814_v39  ;;  %vm1857_vm8 = vmor %vm430_vm1, %vm431_vm3  ;;  %501 = vst [vmem:[#allocation3 + $0x38] sm:$0xff] %v1524_v34 }
  0xd2   : > { %v426_v46 = vmul.f32 %v1812_v38, %v425_v42  ;;  %v385_v47 = vmul.f32 %v1823_v44, %v1808_v31  ;;  %1258 = vrsqrt.f32 %v1816_v40  ;;  %vm391_vm7 = vweird.f32 %v1823_v44  ;;  %vm1867_vm12 = vmor %vm410_vm2, %vm411_vm5  ;;  %502 = vst [vmem:[#allocation3 + $0x8] sm:$0xff] %v1524_v34 }
  0xd3   : > { %v406_v48 = vmul.f32 %v1818_v41, %v405_v45  ;;  %1260 = vrsqrt.f32 %v1821_v43  ;;  %vm420_vm10 = vweird.f32 %v1816_v40  ;;  %vm1880_vm13 = vmor %vm390_vm4, %vm391_vm7  ;;  %vm400_vm0 = vweird.f32 %v1821_v43  ;;  %503 = vst [vmem:[#allocation3 + $0x18] sm:$0xff] %v1524_v34 }
  0xd4   : > { %v427_v49 = vmul.f32 0.5, %v426_v46  ;;  %v386_v50 = vmul.f32 %v1823_v44, %v385_v47  ;;  %v360_v51 = vpop.xlane.xlu1 %359  ;;  %504 = vst [vmem:[#allocation3 + $0x20] sm:$0xff] %v1524_v34 }
  0xd5   : > { %v407_v52 = vmul.f32 0.5, %v406_v48  ;;  %v375_v53 = vmul.f32 %v367_v22, %v360_v51  ;;  %v358_v59 = vpop.xlane.xlu0 %357  ;;  %505 = vst [vmem:[#allocation3 + $0x10] sm:$0xff] %v1524_v34 }
  0xd6   : > { %v428_v54 = vsub.f32 1.5, %v427_v49  ;;  %v387_v55 = vmul.f32 0.5, %v386_v50  ;;  %v374_v10 = vmul.f32 %v367_v22, %v358_v59  ;;  %506 = vst [vmem:[#allocation3 + $0x30] sm:$0xff] %v1524_v34 }
  0xd7   : > { %v1257_v56 = vpop.eup %1256  ;;  %v408_v57 = vsub.f32 1.5, %v407_v52  ;;  %v1835_v58 = vadd.f32 1e-06, %v375_v53  ;;  %507 = vst [vmem:[#allocation3 + $0x28] sm:$0xff] %v1524_v34 }
  0xd8   : > { %v1259_v60 = vpop.eup %1258  ;;  %v388_v61 = vsub.f32 1.5, %v387_v55  ;;  %v435_v62 = vmul.f32 %v1257_v56, %v1814_v39  ;;  %v429_v4 = vmul.f32 %v1812_v38, %v428_v54  ;;  %vm441_vm9 = vweird.f32 %v1257_v56 }
  0xd9   : > { %v1839_v63 = vpop.eup %1260  ;;  %v415_v3 = vmul.f32 %v1259_v60, %v1816_v40  ;;  %1262 = vrsqrt.f32 %v1835_v58  ;;  %v409_v11 = vmul.f32 %v1818_v41, %v408_v57  ;;  %vm421_vm11 = vweird.f32 %v1259_v60  ;;  %vm442_vm15 = vmor %vm440_vm6, %vm441_vm9 }
  0xda   : > { %v436_v5 = vmul.f32 %v1257_v56, %v435_v62  ;;  %v395_v9 = vmul.f32 %v1839_v63, %v1821_v43  ;;  %v389_v15 = vmul.f32 %v1823_v44, %v388_v61  ;;  %v433_v20 = vsel %vm1857_vm8, %v1812_v38, %v429_v4  ;;  %vm422_vm1 = vmor %vm420_vm10, %vm421_vm11 }
  0xdb   : > { %v416_v14 = vmul.f32 %v1259_v60, %v415_v3  ;;  %v1871_v24 = vadd.f32 1e-06, %v374_v10  ;;  %v413_v26 = vsel %vm1867_vm12, %v1818_v41, %v409_v11  ;;  %vm401_vm14 = vweird.f32 %v1839_v63 }
  0xdc   : > { %v437_v16 = vmul.f32 0.5, %v436_v5  ;;  %v396_v17 = vmul.f32 %v1839_v63, %v395_v9  ;;  %v393_v29 = vsel %vm1880_vm13, %v1823_v44, %v389_v15  ;;  %v468_v31 = vmul.f32 %v433_v20, %v1767_v0  ;;  %vm402_vm2 = vmor %vm400_vm0, %vm401_vm14 }
  0xdd   : > { %v417_v19 = vmul.f32 0.5, %v416_v14  ;;  %1264 = vrsqrt.f32 %v1871_v24  ;;  %v466_v37 = vmul.f32 %v413_v26, %v1770_v1  ;;  %v464_v39 = vmul.f32 %v393_v29, %v1773_v2 }
  0xde   : > { %v438_v22 = vsub.f32 1.5, %v437_v16  ;;  %v397_v23 = vmul.f32 0.5, %v396_v17  ;;  %v480_v40 = vmul.f32 %v1247_v35, %v468_v31  ;;  %vm460_vm4 = vweird.f32 %v1835_v58 }
  0xdf   : > { %v1263_v25 = vpop.eup %1262  ;;  %v418_v28 = vsub.f32 1.5, %v417_v19  ;;  %v478_v48 = vmul.f32 %v1247_v35, %v466_v37  ;;  %v476_v50 = vmul.f32 %v1247_v35, %v464_v39  ;;  %vm450_vm7 = vweird.f32 %v1871_v24 }
  0xe0   : > { %v439_v30 = vmul.f32 %v1257_v56, %v438_v22  ;;  %v398_v32 = vsub.f32 1.5, %v397_v23  ;;  %v455_v33 = vmul.f32 %v1263_v25, %v1835_v58  ;;  %vm461_vm3 = vweird.f32 %v1263_v25 }
  0xe1   : > { %v419_v36 = vmul.f32 %v1259_v60, %v418_v28  ;;  %vm462_vm5 = vmor %vm460_vm4, %vm461_vm3 }
  0xe2   : > { %v443_v38 = vsel %vm442_vm15, %v1257_v56, %v439_v30  ;;  %v399_v41 = vmul.f32 %v1839_v63, %v398_v32  ;;  %v456_v0 = vmul.f32 %v1263_v25, %v455_v33 }
  0xe3   : > { %v469_v42 = vmul.f32 %v443_v38, %v1782_v6  ;;  %v423_v44 = vsel %vm422_vm1, %v1259_v60, %v419_v36  ;;  %v1265_v6 = vpop.eup %1264 }
  0xe4   : > { %v467_v1 = vmul.f32 %v423_v44, %v1785_v7  ;;  %v403_v43 = vsel %vm402_vm2, %v1839_v63, %v399_v41  ;;  %v457_v45 = vmul.f32 0.5, %v456_v0  ;;  %v445_v54 = vmul.f32 %v1265_v6, %v1871_v24 }
  0xe5   : > { %v481_v46 = vmul.f32 %v1247_v35, %v469_v42  ;;  %v465_v47 = vmul.f32 %v403_v43, %v1788_v8  ;;  %vm451_vm6 = vweird.f32 %v1265_v6 }
  0xe6   : > { %v479_v2 = vmul.f32 %v1247_v35, %v467_v1  ;;  %v458_v49 = vsub.f32 1.5, %v457_v45  ;;  %v446_v8 = vmul.f32 %v1265_v6, %v445_v54  ;;  %vm452_vm8 = vmor %vm450_vm7, %vm451_vm6 }
  0xe7   : > { %v1090_v51 = vpack.c.bf16 %v481_v46, %v480_v40  ;;  %v477_v52 = vmul.f32 %v1247_v35, %v465_v47 }
  0xe8   : > { %v1085_v53 = vpack.c.bf16 %v479_v2, %v478_v48  ;;  %v459_v7 = vmul.f32 %v1263_v25, %v458_v49  ;;  %v447_v57 = vmul.f32 0.5, %v446_v8 }
  0xe9   : > { %1098 = vst [vmem:[#allocation2 + $0x18] sm:$0xff] %v1090_v51   ;;  %v1080_v55 = vpack.c.bf16 %v477_v52, %v476_v50 }
  0xea   : > { %1097 = vst [vmem:[#allocation2] sm:$0xff] %v1085_v53   ;;  %v463_v56 = vsel %vm462_vm5, %v1263_v25, %v459_v7  ;;  %v448_v59 = vsub.f32 1.5, %v447_v57 }
  0xeb   : > { %1081 = vst [vmem:[#allocation2 + $0x10] sm:$0xff] %v1080_v55   ;;  %v471_v60 = vmul.f32 %v463_v56, %v1797_v12 }
  0xec   : > { %v449_v61 = vmul.f32 %v1265_v6, %v448_v59 }
  0xed   : > { %v483_v63 = vmul.f32 %v1247_v35, %v471_v60 }
  0xee   : > { %v453_v62 = vsel %vm452_vm8, %v1265_v6, %v449_v61 }
  0xef   : > { %v470_v3 = vmul.f32 %v453_v62, %v1800_v13 }
  0xf1   : > { %v482_v4 = vmul.f32 %v1247_v35, %v470_v3 }
  0xf3   : > { %v1095_v5 = vpack.c.bf16 %v483_v63, %v482_v4 }
  0xf5   : > { %1099 = vst [vmem:[#allocation2 + $0x8] sm:$0xff] %v1095_v5  }
  0xf6 PF: > { %v1067_v58 = vld [vmem:[%s1755_s7 + $0x38] sm:$0xff]  ;;  %v1066_v12 = vld [vmem:[%s1755_s7 + $0x30] sm:$0xff]  ;;  %v1065_v9 = vld [vmem:[%s1755_s7 + $0x28] sm:$0xff]  ;;  %p1048_p13 = scmp.ne.s32.totalorder %s1500_s21, 1 }
  0xf7   : > { %604 = vmatpush.bf16.msra.mxu0 %v1067_v58  ;;  %1100 = vmatpush.bf16.msra.mxu2 %v1067_v58  ;;  %v1064_v13 = vld [vmem:[%s1755_s7 + $0x20] sm:$0xff]  ;;  %v1063_v10 = vld [vmem:[%s1755_s7 + $0x18] sm:$0xff]  ;;  %v1062_v14 = vld [vmem:[%s1755_s7 + $0x10] sm:$0xff] }
  0xf8   : > { %v1075_v11 = vld [vmem:[%s1761_s9 + $0x38] sm:$0xff]  ;;  %v1074_v15 = vld [vmem:[%s1761_s9 + $0x30] sm:$0xff]  ;;  %v1061_v16 = vld [vmem:[%s1755_s7 + $0x8] sm:$0xff] }
  0xf9   : > { %717 = vmatpush.bf16.msra.mxu1 %v1075_v11  ;;  %1108 = vmatpush.bf16.msra.mxu3 %v1075_v11  ;;  %v1073_v17 = vld [vmem:[%s1761_s9 + $0x28] sm:$0xff]  ;;  %v1060_v18 = vld [vmem:[%s1755_s7] sm:$0xff]  ;;  %v1058_v21 = vld [vmem:[#allocation2 + $0x18] sm:$0xff] }
  0xfa   : > { %v1072_v19 = vld [vmem:[%s1761_s9 + $0x20] sm:$0xff]  ;;  %v1056_v20 = vld [vmem:[#allocation2 + $0x10] sm:$0xff]  ;;  %v1071_v22 = vld [vmem:[%s1761_s9 + $0x18] sm:$0xff] }
  0xfb   : > { %605 = vmatpush.bf16.msra.mxu0 %v1066_v12  ;;  %1101 = vmatpush.bf16.msra.mxu2 %v1066_v12  ;;  %v1057_v23 = vld [vmem:[#allocation2] sm:$0xff]  ;;  %v1070_v25 = vld [vmem:[%s1761_s9 + $0x10] sm:$0xff]  ;;  %v1069_v26 = vld [vmem:[%s1761_s9 + $0x8] sm:$0xff] }
  0xfc   : > { %v1059_v24 = vld [vmem:[#allocation2 + $0x8] sm:$0xff]  ;;  %v641_v46 = vld [vmem:[#allocation3] sm:$0xff]  ;;  %v642_v2 = vld [vmem:[#allocation3 + $0x38] sm:$0xff] }
  0xfd   : > { %718 = vmatpush.bf16.msra.mxu1 %v1074_v15  ;;  %1109 = vmatpush.bf16.msra.mxu3 %v1074_v15  ;;  %v1068_v27 = vld [vmem:[%s1761_s9] sm:$0xff]  ;;  %v646_v55 = vld [vmem:[#allocation3 + $0x10] sm:$0xff]  ;;  %v644_v57 = vld [vmem:[#allocation3 + $0x18] sm:$0xff] }
  0xfe   : > { %v645_v50 = vld [vmem:[#allocation3 + $0x20] sm:$0xff]  ;;  %v643_v53 = vld [vmem:[#allocation3 + $0x8] sm:$0xff]  ;;  %v647_v61 = vld [vmem:[#allocation3 + $0x30] sm:$0xff] }
  0xff   : > { %606 = vmatpush.bf16.msra.mxu0 %v1065_v9  ;;  %1102 = vmatpush.bf16.msra.mxu2 %v1065_v9  ;;  %v648_v3 = vld [vmem:[#allocation3 + $0x28] sm:$0xff] }
 0x101   : > { %719 = vmatpush.bf16.msra.mxu1 %v1073_v17  ;;  %1110 = vmatpush.bf16.msra.mxu3 %v1073_v17 }
 0x103   : > { %607 = vmatpush.bf16.msra.mxu0 %v1064_v13  ;;  %1103 = vmatpush.bf16.msra.mxu2 %v1064_v13 }
 0x105   : > { %720 = vmatpush.bf16.msra.mxu1 %v1072_v19  ;;  %1111 = vmatpush.bf16.msra.mxu3 %v1072_v19 }
 0x107   : > { %608 = vmatpush.bf16.msra.mxu0 %v1063_v10  ;;  %1104 = vmatpush.bf16.msra.mxu2 %v1063_v10 }
 0x109   : > { %721 = vmatpush.bf16.msra.mxu1 %v1071_v22  ;;  %1112 = vmatpush.bf16.msra.mxu3 %v1071_v22 }
 0x10b   : > { %609 = vmatpush.bf16.msra.mxu0 %v1062_v14  ;;  %1105 = vmatpush.bf16.msra.mxu2 %v1062_v14 }
 0x10d   : > { %722 = vmatpush.bf16.msra.mxu1 %v1070_v25  ;;  %1113 = vmatpush.bf16.msra.mxu3 %v1070_v25 }
 0x10f   : > { %610 = vmatpush.bf16.msra.mxu0 %v1061_v16  ;;  %1106 = vmatpush.bf16.msra.mxu2 %v1061_v16 }
 0x111   : > { %723 = vmatpush.bf16.msra.mxu1 %v1069_v26  ;;  %1114 = vmatpush.bf16.msra.mxu3 %v1069_v26 }
 0x113   : > { %611 = vmatpush.bf16.msra.mxu0 %v1060_v18  ;;  %1107 = vmatpush.bf16.msra.mxu2 %v1060_v18 }
 0x115   : > { %724 = vmatpush.bf16.msra.mxu1 %v1068_v27  ;;  %1115 = vmatpush.bf16.msra.mxu3 %v1068_v27 }
 0x116   : > { %612 = vmatmul.bf16.vlgmr.msra.gmra.mxu0 %v1056_v20  ;;  %622 = vmatmul.bf16.vlgmr.msra.gmra.mxu2 %v1058_v21 }
 0x126   : > { %617 = vmatmul.bf16.gmra.mxu0 %v1057_v23  ;;  %627 = vmatmul.bf16.gmra.mxu2 %v1059_v24 }
 0x193   : > { %v613_v28 = vpop.f32.mrf.mxu0 }
 0x194   : > { %v633_v30 = vmax.f32 %v613_v28, 0.0 }
 0x199   : > { %v623_v29 = vpop.f32.mrf.mxu2 }
 0x19a   : > { %v637_v31 = vmax.f32 %v623_v29, 0.0 }
 0x19b   : > { %v615_v32 = vpop.f32.mrf.mxu0 }
 0x19c   : > { %v634_v33 = vmax.f32 %v615_v32, 0.0 }
 0x19e   : > { %v649_v34 = vpack.c.bf16 %v634_v33, %v633_v30 }
 0x1a0   : > { %725 = vmatmul.bf16.vlgmr.msra.gmra.mxu1 %v649_v34 }
 0x1a1   : > { %v625_v35 = vpop.f32.mrf.mxu2 }
 0x1a2   : > { %v638_v36 = vmax.f32 %v625_v35, 0.0 }
 0x1a3   : > { %v618_v37 = vpop.f32.mrf.mxu0 }
 0x1a4   : > { %v651_v38 = vpack.c.bf16 %v638_v36, %v637_v31  ;;  %v635_v0 = vmax.f32 %v618_v37, 0.0 }
 0x1a6   : > { %735 = vmatmul.bf16.vlgmr.msra.gmra.mxu3 %v651_v38 }
 0x1a9   : > { %v628_v41 = vpop.f32.mrf.mxu2 }
 0x1aa   : > { %v639_v43 = vmax.f32 %v628_v41, 0.0 }
 0x1ab   : > { %v620_v39 = vpop.f32.mrf.mxu0 }
 0x1ac   : > { %v636_v42 = vmax.f32 %v620_v39, 0.0 }
 0x1ae   : > { %v650_v44 = vpack.c.bf16 %v636_v42, %v635_v0 }
 0x1b0   : > { %730 = vmatmul.bf16.gmra.mxu1 %v650_v44 }
 0x1b1   : > { %v630_v1 = vpop.f32.mrf.mxu2 }
 0x1b2   : > { %v640_v45 = vmax.f32 %v630_v1, 0.0 }
 0x1b4   : > { %v652_v40 = vpack.c.bf16 %v640_v45, %v639_v43 }
 0x1b6   : > { %740 = vmatmul.bf16.gmra.mxu3 %v652_v40 }
 0x21d   : > { %v726_v47 = vpop.f32.mrf.mxu1 }
 0x21e   : > { %v746_v48 = vadd.f32 %v726_v47, %v641_v46 }
 0x220   : > { %754 = vst [vmem:[#allocation3] sm:$0xff] %v746_v48 }
 0x225   : > { %v728_v49 = vpop.f32.mrf.mxu1 }
 0x226   : > { %v747_v6 = vadd.f32 %v728_v49, %v642_v2 }
 0x228   : > { %755 = vst [vmem:[#allocation3 + $0x38] sm:$0xff] %v747_v6 }
 0x229   : > { %v736_v51 = vpop.f32.mrf.mxu3 }
 0x22a   : > { %v750_v52 = vadd.f32 %v736_v51, %v645_v50 }
 0x22c   : > { %758 = vst [vmem:[#allocation3 + $0x20] sm:$0xff] %v750_v52 }
 0x22d   : > { %v731_v7 = vpop.f32.mrf.mxu1 }
 0x22e   : > { %v748_v54 = vadd.f32 %v731_v7, %v643_v53 }
 0x230   : > { %756 = vst [vmem:[#allocation3 + $0x8] sm:$0xff] %v748_v54 }
 0x231   : > { %v738_v8 = vpop.f32.mrf.mxu3 }
 0x232   : > { %v751_v56 = vadd.f32 %v738_v8, %v646_v55 }
 0x234   : > { %759 = vst [vmem:[#allocation3 + $0x10] sm:$0xff] %v751_v56 }
 0x235   : > { %v733_v59 = vpop.f32.mrf.mxu1 }
 0x236   : > { %v749_v60 = vadd.f32 %v733_v59, %v644_v57 }
 0x238   : > { %757 = vst [vmem:[#allocation3 + $0x18] sm:$0xff] %v749_v60 }
 0x239   : > { %v741_v62 = vpop.f32.mrf.mxu3 }
 0x23a   : > { %v752_v63 = vadd.f32 %v741_v62, %v647_v61 }
 0x23c   : > { %760 = vst [vmem:[#allocation3 + $0x30] sm:$0xff] %v752_v63 }
 0x240   : > { %765 = sbr.rel (%p1048_p13) target bundleno = 592 (0x250), region = 60 }
 0x241   : > { %v743_v4 = vpop.f32.mrf.mxu3 }
 0x242   : > { %v753_v5 = vadd.f32 %v743_v4, %v648_v3 }
 0x244   : > { %761 = vst [vmem:[#allocation3 + $0x28] sm:$0xff] %v753_v5 }
 0x245   : > { %v766_v58 = vld [vmem:[%s1744_s12] sm:$0xff]  ;;  %v767_v9 = vld [vmem:[%s1744_s12 + $0x8] sm:$0xff]  ;;  %v775_v10 = vld [vmem:[#allocation3 + $0x38] sm:$0xff] }
 0x246   : > { %v774_v12 = vld [vmem:[#allocation3] sm:$0xff]  ;;  %v768_v11 = vld [vmem:[%s1744_s12 + $0x10] sm:$0xff]  ;;  %v776_v14 = vld [vmem:[#allocation3 + $0x8] sm:$0xff]  ;;  %v783_v15 = vadd.f32 %v775_v10, %v767_v9 }
 0x247   : > { %v782_v13 = vadd.f32 %v774_v12, %v766_v58  ;;  %v784_v16 = vadd.f32 %v776_v14, %v768_v11  ;;  %v769_v17 = vld [vmem:[%s1744_s12 + $0x18] sm:$0xff]  ;;  %v770_v19 = vld [vmem:[%s1744_s12 + $0x20] sm:$0xff]  ;;  %v771_v22 = vld [vmem:[%s1744_s12 + $0x28] sm:$0xff] }
 0x248   : > { %v777_v18 = vld [vmem:[#allocation3 + $0x18] sm:$0xff]  ;;  %v778_v21 = vld [vmem:[#allocation3 + $0x20] sm:$0xff]  ;;  %v779_v23 = vld [vmem:[#allocation3 + $0x10] sm:$0xff]  ;;  %791 = vst [vmem:[%s1763_s30 + $0x8] sm:$0xff] %v783_v15 }
 0x249   : > { %790 = vst [vmem:[%s1763_s30] sm:$0xff] %v782_v13  ;;  %v785_v20 = vadd.f32 %v777_v18, %v769_v17  ;;  %v786_v24 = vadd.f32 %v778_v21, %v770_v19  ;;  %v787_v25 = vadd.f32 %v779_v23, %v771_v22  ;;  %v772_v26 = vld [vmem:[%s1744_s12 + $0x30] sm:$0xff]  ;;  %v773_v28 = vld [vmem:[%s1744_s12 + $0x38] sm:$0xff] }
 0x24a   : > { %v780_v27 = vld [vmem:[#allocation3 + $0x30] sm:$0xff]  ;;  %792 = vst [vmem:[%s1763_s30 + $0x10] sm:$0xff] %v784_v16 }
 0x24b   : > { %v788_v29 = vadd.f32 %v780_v27, %v772_v26  ;;  %v781_v30 = vld [vmem:[#allocation3 + $0x28] sm:$0xff]  ;;  %793 = vst [vmem:[%s1763_s30 + $0x18] sm:$0xff] %v785_v20 }
 0x24c   : > { %v789_v32 = vadd.f32 %v781_v30, %v773_v28  ;;  %794 = vst [vmem:[%s1763_s30 + $0x20] sm:$0xff] %v786_v24 }
 0x24d   : > { %795 = vst [vmem:[%s1763_s30 + $0x28] sm:$0xff] %v787_v25 }
 0x24e   : > { %796 = vst [vmem:[%s1763_s30 + $0x30] sm:$0xff] %v788_v29 }
 0x24f   : > { %797 = vst [vmem:[%s1763_s30 + $0x38] sm:$0xff] %v789_v32 }
 0x250 PF: > { %s1076_s21 = sshll.u32 %s1504_s22, 6  ;;  %s811_s8 = sshll.u32 %s1763_s30, 4  ;;  %s812_s8 = int_to_ptr.vmem [resolvable:$true] %s811_s8 }
 0x251   : > { %s810_s10 = scalar_lea.hbm %s2003_s4, %s1076_s21  ;;  %s799_s14 = scalar_lea.sflag [#allocation6], %s259_s2 }
 0x252   : > { %s813_s5 = sshll.u32 %s810_s10, 4  ;;  %s1406_s22 = scalar_lea.hbm %s2003_s4, 128  ;;  %s814_s5 = int_to_ptr.hbm [resolvable:$true] %s813_s5 }
 0x253   : > { %s1400_s29 = sshra.s32 %s814_s5, 4  ;;  %s1401_s29 = int_to_ptr.hbm [resolvable:$true] %s1400_s29 }
 0x254   : > { %s1402_s27 = scalar_lea.hbm %s1401_s29, 64  ;;  %p1407_p4 = scmp.lt.s32.totalorder %s1401_s29, %s2003_s4 }
 0x255   : > { %p1403_p0 = scmp.ne.s32.totalorder %s1401_s29, %s1402_s27  ;;  %p1408_p5 = scmp.lt.s32.totalorder %s1406_s22, %s1402_s27 }
 0x257   : > { %p1404_p2 = pnand %p1403_p0, %p1706_p6  ;;  %p1409_p8 = por %p1408_p5, %p1407_p4 }
 0x259   : > { %p1405_p3 = pneg %p1404_p2 }
 0x25b   : > { %p1410_p9 = pnand %p1409_p8, %p1405_p3 }
 0x25d   : > { %1413 = shalt.err (!%p1410_p9)
}
 0x25e   : > { %s1525_s2 = smov 128   ;;  %s1526_s12 = smov 8  }
 0x25f   : > { %1126 = dma.vmem_to_hbm [thread:$0]  (%p1706_p6), %s812_s8, 1024, %s814_s5, %s799_s14, %s1525_s2, %s1525_s2, %s1526_s12  }
 0x260 PF: > { %p1149_p10 = scmp.ge.s32.totalorder %s1516_s25, 2  ;;  %s828_s20 = sand.u32 1, %s1488_s18  }
 0x261   : > { %s829_s11 = scalar_lea.sflag [#allocation6], %s828_s20 }
 0x262   : > { %p1143_p1 = pnand %p1149_p10, %p1710_p7 }
 0x264   : > { %p1144_p12 = pneg %p1143_p1 }
 0x266   : > { %1471 = dma.done.wait (%p1144_p12), %s829_s11, 1024  }
 0x267   : > { %1473 = vsyncadd (%p1144_p12), %s829_s11, 4294966272  ;;  %s21_s25 = sadd.s32 1, %s1516_s25   ;;  %s2038_s7 = sld [smem:[#allocation21_spill]] }
 0x268   : > { %p18_p11 = scmp.ge.s32.totalorder %s21_s25, 6   ;;  %s2039_s26 = sld [smem:[#allocation16_spill]] }
 0x269   : > { %s2040_s20 = sld [smem:[#allocation20_spill]]  ;;  %s2044_s15 = smov %s1480_s16 }
 0x26a   : > { %s2041_s22 = sld [smem:[#allocation17_spill]]  ;;  %s2045_s16 = smov %s1484_s17 }
 0x26b   : > { %s2042_s9 = sld [smem:[#allocation18_spill]]  ;;  %s2047_s18 = smov %s1492_s19 }
 0x26c   : > { %s2043_s24 = sld [smem:[#allocation19_spill]]  ;;  %s2049_s21 = smov %s1508_s23 }
 0x26d   : > { %s2046_s17 = smov %s2038_s7  ;;  %20 = sbr.rel (!%p18_p11) target bundleno = 14 (0xe), region = 115 }
 0x26e   : > { %s2048_s19 = smov %s2039_s26 }
 0x271   : > { %s2050_s23 = smov %s2042_s9 }
 0x272   :  { %835 = vsyncpa [#allocation5], 1 }
 0x273   :  { %837 = vsyncpa [#allocation5 + $0x1], 1 }
 0x274   :  { %838 = vsyncpa [#allocation8], 1 }
 0x275   :  { %839 = vsyncpa [#allocation6], 1 }
 0x276   :  { %841 = vsyncpa [#allocation6 + $0x1], 1 }

</bundles_post_ra>
